<compile_context>
chip_gen: v7x
topology: tpu7x:2x2x1
jax: 0.10.0
libtpu: 0.0.40
codegen_flags: <defaults>
</compile_context>

<pallas_src>
import jax
import jax.numpy as jnp
from jax.experimental import pallas as pl
from jax.experimental.pallas import tpu as pltpu

EPS = 1e-5
_LANE = 128                     # TPU lane width: channel padding target
_BN_TILE = 256                  # row tile for the BN passes
_ROW_TILE = 8                   # output-row tile for the conv kernels
_VMEM_LIMIT = 48 * 1024 * 1024  # above v6e/v5e defaults, below v7x physical


def _ceil_to(v, m):
    return (v + m - 1) // m * m


def _row_tile(hout):
    for t in range(min(_ROW_TILE, hout), 0, -1):
        if hout % t == 0:
            return t
    return 1


# ------------------------------ BatchNorm kernels ------------------------------ #

def bn_stats_kernel(x_ref, sum_ref, sq_ref):
    """Accumulate per-channel sum / sum-of-squares across the M-tiled grid."""
    @pl.when(pl.program_id(0) == 0)
    def _init():
        sum_ref[...] = jnp.zeros_like(sum_ref)
        sq_ref[...] = jnp.zeros_like(sq_ref)

    x = x_ref[...].astype(jnp.float32)
    sum_ref[...] += jnp.sum(x, axis=0, keepdims=True)
    sq_ref[...] += jnp.sum(x * x, axis=0, keepdims=True)


def bn_relu_kernel(x_ref, scale_ref, shift_ref, o_ref):
    """Tiled y = relu(x * scale + shift); emitted in o_ref.dtype (bf16 for the MXU)."""
    y = jnp.maximum(x_ref[...].astype(jnp.float32) * scale_ref[...] + shift_ref[...], 0.0)
    o_ref[...] = y.astype(o_ref.dtype)


def _bn_stats(x_flat, tm):
    m_pad, c = x_flat.shape
    return pl.pallas_call(
        bn_stats_kernel,
        grid=(m_pad // tm,),
        in_specs=[pl.BlockSpec((tm, c), lambda i: (i, 0))],
        out_specs=(pl.BlockSpec((1, c), lambda i: (0, 0)),
                   pl.BlockSpec((1, c), lambda i: (0, 0))),
        out_shape=(jax.ShapeDtypeStruct((1, c), jnp.float32),
                   jax.ShapeDtypeStruct((1, c), jnp.float32)),
        compiler_params=pltpu.CompilerParams(dimension_semantics=("arbitrary",)),
    )(x_flat)


def _bn_relu(x_flat, scale, shift, tm, out_dtype=jnp.bfloat16):
    m_pad, c = x_flat.shape
    return pl.pallas_call(
        bn_relu_kernel,
        grid=(m_pad // tm,),
        in_specs=[pl.BlockSpec((tm, c), lambda i: (i, 0)),
                  pl.BlockSpec((1, c), lambda i: (0, 0)),
                  pl.BlockSpec((1, c), lambda i: (0, 0))],
        out_specs=pl.BlockSpec((tm, c), lambda i: (i, 0)),
        out_shape=jax.ShapeDtypeStruct((m_pad, c), out_dtype),
        compiler_params=pltpu.CompilerParams(dimension_semantics=("parallel",)),
    )(x_flat, scale, shift)


def _bn_relu_2pass(x4d, gamma_p, beta_p):
    """Training-mode BatchNorm (biased var) + ReLU on NHWC channel-padded f32 input.

    Returns bf16 activations of the same shape (padded channels stay exactly zero)."""
    n, h, w, c = x4d.shape
    m = n * h * w
    tm = min(_BN_TILE, _ceil_to(m, 16))
    m_pad = _ceil_to(m, tm)
    x_flat = x4d.reshape(m, c)
    if m_pad != m:
        x_flat = jnp.pad(x_flat, ((0, m_pad - m), (0, 0)))  # zero rows: no effect on stats
    csum, csq = _bn_stats(x_flat, tm)
    mean = csum / m
    var = jnp.maximum(csq / m - mean * mean, 0.0)           # biased variance (training BN)
    scale = gamma_p * jax.lax.rsqrt(var + EPS)
    shift = beta_p - mean * scale
    act = _bn_relu(x_flat, scale, shift, tm)
    return act[:m].reshape(n, h, w, c)


# -------------------------------- conv kernels --------------------------------- #

def _flatten_rows(v, rows, cols):
    # (A, B, C) -> (A*B, C).  Route the merge through f32 so the reshape is a pure tile
    # re-indexing even for packed bf16 values, then return to bf16 for the MXU.
    return v.astype(jnp.float32).reshape(rows, cols).astype(jnp.bfloat16)


def _make_conv_kernel(stride, th, wout, cin, cout, mode, n_planes, sc_c):
    # Tap (kh, kw) of a stride-s 3x3 conv reads phase plane (kh % s, kw % s) at the
    # contiguous offset (kh // s, kw // s).
    taps = [((kh % stride) * stride + (kw % stride), kh // stride, kw // stride)
            for kh in range(3) for kw in range(3)]
    rows = th * wout

    def kernel(*refs):
        plane_refs = refs[:n_planes]
        w_ref = refs[n_planes]
        extra = refs[n_planes + 1:-1]
        o_ref = refs[-1]

        base = pl.multiple_of(pl.program_id(1) * th, th)
        acc = jnp.zeros((rows, cout), jnp.float32)
        for t, (p, dh, dw) in enumerate(taps):
            win = plane_refs[p][pl.ds(base + dh, th), pl.ds(dw, wout), :]
            acc += jnp.dot(_flatten_rows(win, rows, cin), w_ref[t],
                           preferred_element_type=jnp.float32)
        if mode == "identity":       # equalInOut: add the original (pre-BN) input tile
            acc += extra[0][...].astype(jnp.float32).reshape(rows, cout)
        elif mode == "shortcut":     # fuse the 1x1 shortcut GEMM into the same accumulator
            acc += jnp.dot(_flatten_rows(extra[0][...], rows, sc_c), extra[1][...],
                           preferred_element_type=jnp.float32)
        o_ref[...] = acc.reshape(th, wout, cout)

    return kernel


def _phase_planes(xp, stride, hout, wout):
    """Split the spatially padded activation into stride*stride contiguous phase planes."""
    if stride == 1:
        return [xp]
    hp, wp = hout + 1, wout + 1
    planes = []
    for a in range(stride):
        for b in range(stride):
            p = xp[:, a::stride, b::stride, :][:, :hp, :wp, :]
            dh, dw = hp - p.shape[1], wp - p.shape[2]
            if dh or dw:
                p = jnp.pad(p, ((0, 0), (0, dh), (0, dw), (0, 0)))
            planes.append(p)
    return planes


def _conv3x3(x_act, w9, stride, mode, res=None, sc=None, wsc=None):
    """3x3 conv (pad=1) over bf16 NHWC activations as 9 fused MXU GEMMs (+ fused residual).

    mode: "plain" | "identity" (adds `res`, f32) | "shortcut" (accumulates `sc` @ `wsc`)."""
    n, h, w, cin = x_act.shape
    cout = w9.shape[-1]
    hout = (h - 1) // stride + 1
    wout = (w - 1) // stride + 1
    th = _row_tile(hout)
    sc_c = sc.shape[-1] if mode == "shortcut" else None

    xp = jnp.pad(x_act, ((0, 0), (1, 1), (1, 1), (0, 0)))
    planes = _phase_planes(xp, stride, hout, wout)
    kernel = _make_conv_kernel(stride, th, wout, cin, cout, mode, len(planes), sc_c)

    in_specs, args = [], []
    for p in planes:
        hp, wp = p.shape[1], p.shape[2]
        in_specs.append(pl.BlockSpec((None, hp, wp, cin), lambda ni, ri: (ni, 0, 0, 0)))
        args.append(p)
    in_specs.append(pl.BlockSpec((9, cin, cout), lambda ni, ri: (0, 0, 0)))
    args.append(w9)
    if mode == "identity":
        in_specs.append(pl.BlockSpec((None, th, wout, cout), lambda ni, ri: (ni, ri, 0, 0)))
        args.append(res)
    elif mode == "shortcut":
        in_specs.append(pl.BlockSpec((None, th, wout, sc_c), lambda ni, ri: (ni, ri, 0, 0)))
        args.append(sc)
        in_specs.append(pl.BlockSpec((sc_c, cout), lambda ni, ri: (0, 0)))
        args.append(wsc)

    return pl.pallas_call(
        kernel,
        grid=(n, hout // th),
        in_specs=in_specs,
        out_specs=pl.BlockSpec((None, th, wout, cout), lambda ni, ri: (ni, ri, 0, 0)),
        out_shape=jax.ShapeDtypeStruct((n, hout, wout, cout), jnp.float32),
        compiler_params=pltpu.CompilerParams(
            dimension_semantics=("parallel", "parallel"),
            vmem_limit_bytes=_VMEM_LIMIT),
    )(*args)


# ------------------------------ block / module glue ----------------------------- #

def _basic_block(x, lp, cin, cout, stride):
    """One WideResNet BasicBlock on NHWC channel-padded f32 input; returns f32."""
    equal = cin == cout
    if equal:
        assert stride == 1, "identity shortcut requires stride == 1"

    x_act = _bn_relu_2pass(x, lp["bn1_gamma"], lp["bn1_beta"])      # relu1(bn1(x)), bf16
    y1 = _conv3x3(x_act, lp["w1"], stride, "plain")                 # conv1, f32
    out_act = _bn_relu_2pass(y1, lp["bn2_gamma"], lp["bn2_beta"])   # relu2(bn2(.)), bf16
    # dropRate == 0.0 -> dropout is a no-op here.

    if equal:                                                       # conv2 + identity add
        return _conv3x3(out_act, lp["w2"], 1, "identity", res=x)
    sc_in = x_act[:, ::stride, ::stride, :][:, :y1.shape[1], :y1.shape[2], :]
    return _conv3x3(out_act, lp["w2"], 1, "shortcut", sc=sc_in, wsc=lp["wsc"])


def _prep_layer_params(p, cin, cout):
    """Pad BN params to (1, Cpad) f32 and conv weights to lane-dense bf16 GEMM layouts."""
    cinp, coutp = _ceil_to(cin, _LANE), _ceil_to(cout, _LANE)

    def vec(v, c, cp):
        return jnp.pad(v.astype(jnp.float32), (0, cp - c)).reshape(1, cp)

    def w3x3(w, ci, co, cip, cop):
        w = jnp.transpose(w, (2, 3, 1, 0))                          # OIHW -> (kh, kw, I, O)
        w = jnp.pad(w, ((0, 0), (0, 0), (0, cip - ci), (0, cop - co)))
        return w.reshape(9, cip, cop).astype(jnp.bfloat16)

    lp = {
        "bn1_gamma": vec(p["bn1_gamma"], cin, cinp),
        "bn1_beta": vec(p["bn1_beta"], cin, cinp),
        "bn2_gamma": vec(p["bn2_gamma"], cout, coutp),
        "bn2_beta": vec(p["bn2_beta"], cout, coutp),
        "w1": w3x3(p["conv1_w"], cin, cout, cinp, coutp),
        "w2": w3x3(p["conv2_w"], cout, cout, coutp, coutp),
    }
    if "convsc_w" in p:
        wsc = jnp.pad(p["convsc_w"][:, :, 0, 0].T, ((0, cinp - cin), (0, coutp - cout)))
        lp["wsc"] = wsc.astype(jnp.bfloat16)
    return lp


def network_block_forward(x_nchw, layer_params, in_channels, out_channels, stride,
                          droprate=0.0):
    """NetworkBlock forward: nb_layers = len(layer_params) BasicBlocks. NCHW in/out."""
    assert droprate == 0.0  # dropout is a no-op at dropRate == 0
    n, c, h, w = x_nchw.shape
    assert c == in_channels
    cinp = _ceil_to(in_channels, _LANE)
    x = jnp.transpose(x_nchw, (0, 2, 3, 1)).astype(jnp.float32)     # NHWC, kept end-to-end
    x = jnp.pad(x, ((0, 0), (0, 0), (0, 0), (0, cinp - in_channels)))
    for i, p in enumerate(layer_params):
        cin = in_channels if i == 0 else out_channels
        s = stride if i == 0 else 1
        lp = _prep_layer_params(p, cin, out_channels)
        x = _basic_block(x, lp, cin, out_channels, s)
    y = x[..., :out_channels]
    return jnp.transpose(y, (0, 3, 1, 2))                           # back to NCHW


def init_network_block_params(key, nb_layers, in_channels, out_channels):
    layers = []
    for i in range(nb_layers):
        cin = in_channels if i == 0 else out_channels
        key, sub = jax.random.split(key)
        ks = jax.random.split(sub, 7)
        p = {
            "bn1_gamma": jax.random.uniform(ks[0], (cin,), jnp.float32, 0.5, 1.5),
            "bn1_beta": jax.random.normal(ks[1], (cin,), jnp.float32) * 0.1,
            "bn2_gamma": jax.random.uniform(ks[2], (out_channels,), jnp.float32, 0.5, 1.5),
            "bn2_beta": jax.random.normal(ks[3], (out_channels,), jnp.float32) * 0.1,
            "conv1_w": jax.random.normal(ks[4], (out_channels, cin, 3, 3), jnp.float32) * 0.1,
            "conv2_w": jax.random.normal(ks[5], (out_channels, out_channels, 3, 3),
                                         jnp.float32) * 0.1,
        }
        if cin != out_channels:
            p["convsc_w"] = jax.random.normal(ks[6], (out_channels, cin, 1, 1),
                                              jnp.float32) * 0.1
        layers.append(p)
    return layers


# ------------------------------ pure-JAX reference ------------------------------ #

def reference_forward(x, layer_params, in_channels, out_channels, stride):
    def bn_relu(x, g, b):
        mean = jnp.mean(x, axis=(0, 2, 3), keepdims=True)
        var = jnp.mean(jnp.square(x - mean), axis=(0, 2, 3), keepdims=True)
        xh = (x - mean) * jax.lax.rsqrt(var + EPS)
        return jnp.maximum(xh * g.reshape(1, -1, 1, 1) + b.reshape(1, -1, 1, 1), 0.0)

    def conv(x, w, s, pad):
        return jax.lax.conv_general_dilated(
            x, w, (s, s), [(pad, pad), (pad, pad)],
            dimension_numbers=("NCHW", "OIHW", "NCHW"),
            precision=jax.lax.Precision.HIGHEST)

    for i, p in enumerate(layer_params):
        cin = in_channels if i == 0 else out_channels
        s = stride if i == 0 else 1
        equal = cin == out_channels
        x_act = bn_relu(x, p["bn1_gamma"], p["bn1_beta"])
        out = conv(x_act, p["conv1_w"], s, 1)
        out = bn_relu(out, p["bn2_gamma"], p["bn2_beta"])
        out = conv(out, p["conv2_w"], 1, 1)
        short = x if equal else conv(x_act, p["convsc_w"], s, 0)
        x = short + out
    return x


if __name__ == "__main__":
    key = jax.random.PRNGKey(0)
    kx, kp = jax.random.split(key)

    nb_layers, in_c, out_c, stride = 2, 4, 8, 2        # downsampling NetworkBlock, 2 layers
    x = jax.random.normal(kx, (2, in_c, 16, 16), jnp.float32)   # NCHW, like PyTorch
    params = init_network_block_params(kp, nb_layers, in_c, out_c)

    y = network_block_forward(x, params, in_c, out_c, stride, droprate=0.0)
    y = jax.block_until_ready(y)

    y_ref = reference_forward(x, params, in_c, out_c, stride)
    assert y.shape == (2, out_c, 8, 8), y.shape
    assert bool(jnp.allclose(y, y_ref, rtol=5e-2, atol=5e-2)), "mismatch vs JAX reference"

    print("KERNEL_OK")
</pallas_src>

<mosaic_0001>
module attributes {stable_mosaic.version = 11 : i64} {
  func.func @bn_stats_kernel(%arg0: i32, %arg1: memref<256x128xf32, #tpu.memory_space<vmem>>, %arg2: memref<1x128xf32, #tpu.memory_space<vmem>>, %arg3: memref<1x128xf32, #tpu.memory_space<vmem>>) attributes {dimension_semantics = [#tpu.dimension_semantics<arbitrary>], iteration_bounds = array<i64: 2>, scalar_prefetch = 0 : i64, scratch_operands = 0 : i64, tpu.core_type = #tpu.core_type<tc>, window_params = [{transform_indices = @transform_0, window_bounds = array<i64: 256, 128>}, {pipeline_mode = #tpu.pipeline_mode<synchronous>, transform_indices = @transform_1, window_bounds = array<i64: 1, 128>}, {pipeline_mode = #tpu.pipeline_mode<synchronous>, transform_indices = @transform_2, window_bounds = array<i64: 1, 128>}]} {
    %c0_i32 = arith.constant 0 : i32
    %0 = arith.cmpi eq, %arg0, %c0_i32 : i32
    %1 = arith.extui %0 : i1 to i32
    %c0_i32_0 = arith.constant 0 : i32
    %2 = arith.cmpi ne, %1, %c0_i32_0 : i32
    scf.if %2 {
      %cst_11 = arith.constant 0.000000e+00 : f32
      %15 = vector.broadcast %cst_11 : f32 to vector<1x128xf32>
      %c0_12 = arith.constant 0 : index
      %c0_13 = arith.constant 0 : index
      %16 = vector.load %arg2[%c0_12, %c0_13] : memref<1x128xf32, #tpu.memory_space<vmem>>, vector<1x128xf32>
      tpu.vector_store %arg2[%c0_12, %c0_13], %15 {strides = array<i32>} : memref<1x128xf32, #tpu.memory_space<vmem>>, vector<1x128xf32>,
      %cst_14 = arith.constant 0.000000e+00 : f32
      %17 = vector.broadcast %cst_14 : f32 to vector<1x128xf32>
      %c0_15 = arith.constant 0 : index
      %c0_16 = arith.constant 0 : index
      %18 = vector.load %arg3[%c0_15, %c0_16] : memref<1x128xf32, #tpu.memory_space<vmem>>, vector<1x128xf32>
      tpu.vector_store %arg3[%c0_15, %c0_16], %17 {strides = array<i32>} : memref<1x128xf32, #tpu.memory_space<vmem>>, vector<1x128xf32>,
    } else {
    }
    %c0 = arith.constant 0 : index
    %c0_1 = arith.constant 0 : index
    %3 = vector.load %arg1[%c0, %c0_1] : memref<256x128xf32, #tpu.memory_space<vmem>>, vector<256x128xf32>
    %c0_2 = arith.constant 0 : index
    %c0_3 = arith.constant 0 : index
    %4 = vector.load %arg2[%c0_2, %c0_3] : memref<1x128xf32, #tpu.memory_space<vmem>>, vector<1x128xf32>
    %cst = arith.constant dense<0.000000e+00> : vector<128xf32>
    %5 = vector.multi_reduction <add>, %3, %cst [0] : vector<256x128xf32> to vector<128xf32>
    %6 = vector.shape_cast %5 : vector<128xf32> to vector<1x128xf32>
    %7 = arith.addf %4, %6 : vector<1x128xf32>
    %c0_4 = arith.constant 0 : index
    %c0_5 = arith.constant 0 : index
    %8 = vector.load %arg2[%c0_4, %c0_5] : memref<1x128xf32, #tpu.memory_space<vmem>>, vector<1x128xf32>
    tpu.vector_store %arg2[%c0_4, %c0_5], %7 {strides = array<i32>} : memref<1x128xf32, #tpu.memory_space<vmem>>, vector<1x128xf32>,
    %c0_6 = arith.constant 0 : index
    %c0_7 = arith.constant 0 : index
    %9 = vector.load %arg3[%c0_6, %c0_7] : memref<1x128xf32, #tpu.memory_space<vmem>>, vector<1x128xf32>
    %10 = arith.mulf %3, %3 : vector<256x128xf32>
    %cst_8 = arith.constant dense<0.000000e+00> : vector<128xf32>
    %11 = vector.multi_reduction <add>, %10, %cst_8 [0] : vector<256x128xf32> to vector<128xf32>
    %12 = vector.shape_cast %11 : vector<128xf32> to vector<1x128xf32>
    %13 = arith.addf %9, %12 : vector<1x128xf32>
    %c0_9 = arith.constant 0 : index
    %c0_10 = arith.constant 0 : index
    %14 = vector.load %arg3[%c0_9, %c0_10] : memref<1x128xf32, #tpu.memory_space<vmem>>, vector<1x128xf32>
    tpu.vector_store %arg3[%c0_9, %c0_10], %13 {strides = array<i32>} : memref<1x128xf32, #tpu.memory_space<vmem>>, vector<1x128xf32>,
    return
  }
  func.func @transform_0(%arg0: i32) -> (i32, i32) {
    %c0_i32 = arith.constant 0 : i32
    %c0_i32_0 = arith.constant 0 : i32
    return %arg0, %c0_i32 : i32, i32
  }
  func.func @transform_1(%arg0: i32) -> (i32, i32) {
    %c0_i32 = arith.constant 0 : i32
    %c0_i32_0 = arith.constant 0 : i32
    %c0_i32_1 = arith.constant 0 : i32
    return %c0_i32, %c0_i32_0 : i32, i32
  }
  func.func @transform_2(%arg0: i32) -> (i32, i32) {
    %c0_i32 = arith.constant 0 : i32
    %c0_i32_0 = arith.constant 0 : i32
    %c0_i32_1 = arith.constant 0 : i32
    return %c0_i32, %c0_i32_0 : i32, i32
  }
}

</mosaic_0001>

<bundles_post_ra>
// kernel: tpu_custom_call.1
= control target key start
LH: loop header
LB: loop body
LE: loop exit
PB: predicated region body
PF: predicated region fallthrough
CT: control target
= control target key end

     0   :  { %8 = vsyncpa [#allocation3], 0  ;;  %s789_s0 = inlined_call_operand.hbm [shape: f32[512,128], index: 0, kind: input, shape index: {}]   ;;  %s790_s1 = inlined_call_operand.hbm [shape: f32[1,128], index: 1, kind: output, shape index: {0}]   ;;  %s791_s2 = inlined_call_operand.hbm [shape: f32[1,128], index: 2, kind: output, shape index: {1}]  }
   0x1   :  { %10 = vsyncpa [#allocation3 + $0x1], 0 }
   0x2   :  { %11 = vsyncpa [#allocation4], 0 }
   0x3   :  { %12 = vsyncpa [#allocation7], 0  ;;  %s598_s9 = smov 0   ;;  %s600_s10 = smov 0  }
   0x4   :  { %s602_s11 = smov 0   ;;  %s604_s12 = smov 0  }
   0x5 LB: > { %s617_s13 = sadd.s32 4294967295, %s575_s12   ;;  %s620_s14 = sadd.s32 1, %s575_s12   ;;  %s575_s12 = sphi %s604_s12, %s798_s12   ;;  %s571_s11 = sphi %s602_s11, %s797_s11   ;;  %s567_s10 = sphi %s600_s10, %s796_s10   ;;  %s563_s9 = sphi %s598_s9, %s795_s9  }
   0x6   : > { %s22_s15 = ssub.s32 %s575_s12, %s620_s14  ;;  %s25_s16 = sadd.s32 1, %s571_s11 }
   0x7   : > { %p23_p0 = scmp.eq.s32.totalorder %s22_s15, 0  ;;  %p32_p1 = scmp.ne.s32.totalorder %s571_s11, %s567_s10 }
   0x8   : > { %p33_p2 = scmp.eq.s32.totalorder %s575_s12, 0  ;;  %p38_p3 = scmp.ne.s32.totalorder %s567_s10, %s563_s9 }
   0x9   : > { %s630_s17 = scalar_select %p23_p0, %s571_s11, %s25_s16  }
   0xa   : > { %p34_p4 = por %p33_p2, %p32_p1  ;;  %p39_p5 = scmp.eq.s32.totalorder %s617_s13, 0 }
   0xb   : > { %p409_p6 = scmp.lt.s32.totalorder %s575_s12, 2  ;;  %s104_s19 = sand.u32 1, %s571_s11  }
   0xc   : > { %p634_p7 = por %p39_p5, %p38_p3  ;;  %s382_s20 = sshll.u32 %s104_s19, 8 }
   0xd   : > { %s394_s21 = sshll.u32 %s575_s12, 12  ;;  %s108_s25 = scalar_lea.vmem [#allocation2], %s382_s20 }
   0xe   : > { %s643_s24 = scalar_lea.hbm %s789_s0, %s394_s21  ;;  %s115_s26 = sshll.u32 %s108_s25, 4  ;;  %s645_s26 = int_to_ptr.vmem [resolvable:$true] %s115_s26 }
   0xf   : > { %p647_p8 = pnand %p409_p6, %p34_p4  ;;  %s652_s28 = scalar_lea.sflag [#allocation3], %s104_s19 }
  0x10   : > { %s451_s29 = scalar_lea.hbm %s643_s24, 4096  ;;  %s456_s4 = scalar_lea.hbm %s789_s0, 8192 }
  0x11   : > { %p452_p10 = scmp.ne.s32.totalorder %s643_s24, %s451_s29  ;;  %p453_p11 = pneg %p647_p8 }
  0x12   : > { %p457_p0 = scmp.lt.u32.totalorder %s643_s24, %s789_s0  ;;  %p458_p1 = scmp.lt.u32.totalorder %s456_s4, %s451_s29 }
  0x13   : > { %p454_p12 = pnand %p453_p11, %p452_p10  ;;  %p460_p3 = scmp.lt.u32.totalorder %s451_s29, %s643_s24 }
  0x14   : > { %p459_p2 = por %p458_p1, %p457_p0 }
  0x15   : > { %p455_p13 = pneg %p454_p12 }
  0x16   : > { %p461_p4 = por %p460_p3, %p459_p2 }
  0x18   : > { %p462_p5 = pnand %p461_p4, %p455_p13 }
  0x1a   : > { %465 = shalt.err (!%p462_p5)
}
  0x1b   : > { %s466_s7 = scalar_lea.vmem %s645_s26, 4096  ;;  %s577_s8 = smov [#allocation2]  }
  0x1c   : > { %p467_p6 = scmp.ne.s32.totalorder %s645_s26, %s466_s7  ;;  %s471_s9 = sshll.u32 %s577_s8, 4  ;;  %s472_s9 = int_to_ptr.vmem [resolvable:$false] %s471_s9 }
  0x1d   : > { %s473_s15 = scalar_lea.vmem %s472_s9, 8192  ;;  %p474_p9 = scmp.lt.s32.totalorder %s645_s26, %s472_s9 }
  0x1e   : > { %p469_p10 = pnand %p467_p6, %p453_p11  ;;  %p475_p0 = scmp.lt.s32.totalorder %s473_s15, %s466_s7 }
  0x20   : > { %p470_p12 = pneg %p469_p10  ;;  %p476_p1 = por %p475_p0, %p474_p9 }
  0x22   : > { %p477_p2 = pnand %p476_p1, %p470_p12 }
  0x24   : > { %480 = shalt.err (!%p477_p2)
}
  0x25   : > { %s578_s16 = smov 128   ;;  %s579_s19 = smov 8  }
  0x26   : > { %408 = dma.hbm_to_vmem [thread:$0]  (!%p647_p8), %s643_s24, 4096, %s645_s26, %s652_s28, %s578_s16, %s578_s16, %s579_s19  }
  0x27   : > { %p123_p11 = scmp.lt.s32.totalorder %s575_s12, 3  ;;  %p794_p13 = scmp.ge.s32.totalorder %s575_s12, 1 }
  0x29   : > { %p124_p3 = pnand %p794_p13, %p123_p11 }
  0x2a   : > { %s129_s20 = sand.u32 (!%p124_p3), 1, %s567_s10  }
  0x2b   : > { %127 = sbr.rel (%p124_p3) target bundleno = 175 (0xaf), region = 24  ;;  %s386_s21 = sshll.u32 (!%p124_p3), %s129_s20, 8 }
  0x2c   : > { %s130_s22 = scalar_lea.sflag (!%p124_p3), [#allocation3], %s129_s20  ;;  %s684_s23 = scalar_lea.vmem (!%p124_p3), [#allocation2], %s386_s21 }
  0x32   : > { %550 = dma.done.wait (%p634_p7), %s130_s22, 4096  }
  0x33   : > { %552 = vsyncadd (%p634_p7), %s130_s22, 4294963200  ;;  %p387_p9 = scmp.ne.s32.totalorder %s617_s13, 0 }
  0x34   : > { %v580_v0 = vmov (!%p387_p9), 0.0  }
  0x35   : > { %153 = sbr.rel (%p387_p9) target bundleno = 60 (0x3c), region = 32  ;;  %154 = vst [vmem:[#allocation5] sm:$0x1] (!%p387_p9), %v580_v0  ;;  %155 = vst [vmem:[#allocation6] sm:$0x1] (!%p387_p9), %v580_v0 }
  0x3c PF: > { %v156_v1 = vld [vmem:[%s684_s23] sm:$0xff]  ;;  %v157_v2 = vld [vmem:[%s684_s23 + $0x8] sm:$0xff]  ;;  %v158_v3 = vld [vmem:[%s684_s23 + $0x10] sm:$0xff]  ;;  %s581_s12 = smov [#allocation5]   ;;  %p410_p7 = scmp.eq.s32.totalorder %s617_s13, 1 }
  0x3d   : > { %v159_v4 = vld [vmem:[%s684_s23 + $0x18] sm:$0xff]  ;;  %v189_v5 = vadd.f32 %v157_v2, %v156_v1  ;;  %v229_v6 = vmul.f32 %v156_v1, %v156_v1  ;;  %v230_v7 = vmul.f32 %v157_v2, %v157_v2  ;;  %v231_v8 = vmul.f32 %v158_v3, %v158_v3  ;;  %v160_v9 = vld [vmem:[%s684_s23 + $0x20] sm:$0xff]  ;;  %v161_v13 = vld [vmem:[%s684_s23 + $0x28] sm:$0xff]  ;;  %s307_s18 = sshll.u32 %s581_s12, 4  ;;  %s582_s24 = smov [#allocation6]   ;;  %s308_s18 = int_to_ptr.vmem [resolvable:$true] %s307_s18 }
  0x3e   : > { %v232_v11 = vmul.f32 %v159_v4, %v159_v4  ;;  %v233_v15 = vmul.f32 %v160_v9, %v160_v9  ;;  %v162_v17 = vld [vmem:[%s684_s23 + $0x30] sm:$0xff]  ;;  %v234_v19 = vmul.f32 %v161_v13, %v161_v13  ;;  %v163_v21 = vld [vmem:[%s684_s23 + $0x38] sm:$0xff]  ;;  %v164_v25 = vld [vmem:[%s684_s23 + $0x40] sm:$0xff]  ;;  %s318_s25 = sshll.u32 %s582_s24, 4  ;;  %s481_s26 = scalar_lea.vmem %s308_s18, 16  ;;  %s724_s25 = int_to_ptr.vmem [resolvable:$true] %s318_s25 }
  0x3f   : > { %v190_v10 = vadd.f32 %v189_v5, %v158_v3  ;;  %v261_v12 = vadd.f32 %v230_v7, %v229_v6  ;;  %v235_v23 = vmul.f32 %v162_v17, %v162_v17  ;;  %v236_v27 = vmul.f32 %v163_v21, %v163_v21  ;;  %v165_v29 = vld [vmem:[%s684_s23 + $0x48] sm:$0xff]  ;;  %v166_v33 = vld [vmem:[%s684_s23 + $0x50] sm:$0xff]  ;;  %v167_v37 = vld [vmem:[%s684_s23 + $0x58] sm:$0xff]  ;;  %p482_p8 = scmp.ne.s32.totalorder %s308_s18, %s481_s26  ;;  %s487_s27 = scalar_lea.vmem %s308_s18, 32 }
  0x40   : > { %v237_v31 = vmul.f32 %v164_v25, %v164_v25  ;;  %v238_v35 = vmul.f32 %v165_v29, %v165_v29  ;;  %v239_v39 = vmul.f32 %v166_v33, %v166_v33  ;;  %v168_v41 = vld [vmem:[%s684_s23 + $0x60] sm:$0xff]  ;;  %v240_v43 = vmul.f32 %v167_v37, %v167_v37  ;;  %v169_v45 = vld [vmem:[%s684_s23 + $0x68] sm:$0xff]  ;;  %v170_v49 = vld [vmem:[%s684_s23 + $0x70] sm:$0xff]  ;;  %p488_p6 = scmp.lt.s32.totalorder %s308_s18, %s308_s18  ;;  %p489_p10 = scmp.lt.s32.totalorder %s487_s27, %s481_s26 }
  0x41   : > { %v191_v14 = vadd.f32 %v190_v10, %v159_v4  ;;  %v262_v16 = vadd.f32 %v261_v12, %v231_v8  ;;  %v241_v47 = vmul.f32 %v168_v41, %v168_v41  ;;  %v242_v51 = vmul.f32 %v169_v45, %v169_v45  ;;  %v171_v53 = vld [vmem:[%s684_s23 + $0x78] sm:$0xff]  ;;  %v172_v57 = vld [vmem:[%s684_s23 + $0x80] sm:$0xff]  ;;  %v173_v61 = vld [vmem:[%s684_s23 + $0x88] sm:$0xff]  ;;  %p483_p4 = pnand %p482_p8, %p410_p7 }
  0x42   : > { %v243_v55 = vmul.f32 %v170_v49, %v170_v49  ;;  %v244_v59 = vmul.f32 %v171_v53, %v171_v53  ;;  %v245_v63 = vmul.f32 %v172_v57, %v172_v57  ;;  %v174_v1 = vld [vmem:[%s684_s23 + $0x90] sm:$0xff]  ;;  %v246_v3 = vmul.f32 %v173_v61, %v173_v61  ;;  %v175_v5 = vld [vmem:[%s684_s23 + $0x98] sm:$0xff]  ;;  %p490_p12 = por %p489_p10, %p488_p6 }
  0x43   : > { %v192_v18 = vadd.f32 %v191_v14, %v160_v9  ;;  %v263_v20 = vadd.f32 %v262_v16, %v232_v11  ;;  %v247_v7 = vmul.f32 %v174_v1, %v174_v1  ;;  %v176_v9 = vld [vmem:[%s684_s23 + $0xa0] sm:$0xff]  ;;  %v248_v11 = vmul.f32 %v175_v5, %v175_v5  ;;  %p484_p5 = pneg %p483_p4 }
  0x45   : > { %v193_v22 = vadd.f32 %v192_v18, %v161_v13  ;;  %v264_v24 = vadd.f32 %v263_v20, %v233_v15  ;;  %v177_v13 = vld [vmem:[%s684_s23 + $0xa8] sm:$0xff]  ;;  %v249_v15 = vmul.f32 %v176_v9, %v176_v9  ;;  %p491_p0 = pnand %p490_p12, %p484_p5 }
  0x47   : > { %v194_v26 = vadd.f32 %v193_v22, %v162_v17  ;;  %v265_v28 = vadd.f32 %v264_v24, %v234_v19  ;;  %v178_v17 = vld [vmem:[%s684_s23 + $0xb0] sm:$0xff]  ;;  %v250_v19 = vmul.f32 %v177_v13, %v177_v13 }
  0x49   : > { %v195_v30 = vadd.f32 %v194_v26, %v163_v21  ;;  %v266_v32 = vadd.f32 %v265_v28, %v235_v23  ;;  %v179_v21 = vld [vmem:[%s684_s23 + $0xb8] sm:$0xff]  ;;  %v251_v23 = vmul.f32 %v178_v17, %v178_v17 }
  0x4b   : > { %v196_v34 = vadd.f32 %v195_v30, %v164_v25  ;;  %v267_v36 = vadd.f32 %v266_v32, %v236_v27  ;;  %v180_v25 = vld [vmem:[%s684_s23 + $0xc0] sm:$0xff]  ;;  %v252_v27 = vmul.f32 %v179_v21, %v179_v21 }
  0x4d   : > { %v197_v38 = vadd.f32 %v196_v34, %v165_v29  ;;  %v268_v40 = vadd.f32 %v267_v36, %v237_v31  ;;  %v181_v29 = vld [vmem:[%s684_s23 + $0xc8] sm:$0xff]  ;;  %v253_v31 = vmul.f32 %v180_v25, %v180_v25 }
  0x4f   : > { %v198_v42 = vadd.f32 %v197_v38, %v166_v33  ;;  %v269_v44 = vadd.f32 %v268_v40, %v238_v35  ;;  %v182_v33 = vld [vmem:[%s684_s23 + $0xd0] sm:$0xff]  ;;  %v254_v35 = vmul.f32 %v181_v29, %v181_v29 }
  0x51   : > { %v199_v46 = vadd.f32 %v198_v42, %v167_v37  ;;  %v270_v48 = vadd.f32 %v269_v44, %v239_v39  ;;  %v183_v37 = vld [vmem:[%s684_s23 + $0xd8] sm:$0xff]  ;;  %v255_v39 = vmul.f32 %v182_v33, %v182_v33 }
  0x53   : > { %v200_v50 = vadd.f32 %v199_v46, %v168_v41  ;;  %v271_v52 = vadd.f32 %v270_v48, %v240_v43  ;;  %v184_v41 = vld [vmem:[%s684_s23 + $0xe0] sm:$0xff]  ;;  %v256_v43 = vmul.f32 %v183_v37, %v183_v37 }
  0x55   : > { %v201_v54 = vadd.f32 %v200_v50, %v169_v45  ;;  %v272_v56 = vadd.f32 %v271_v52, %v241_v47  ;;  %v185_v45 = vld [vmem:[%s684_s23 + $0xe8] sm:$0xff]  ;;  %v257_v47 = vmul.f32 %v184_v41, %v184_v41 }
  0x57   : > { %v202_v58 = vadd.f32 %v201_v54, %v170_v49  ;;  %v273_v60 = vadd.f32 %v272_v56, %v242_v51  ;;  %v186_v49 = vld [vmem:[%s684_s23 + $0xf0] sm:$0xff]  ;;  %v258_v51 = vmul.f32 %v185_v45, %v185_v45 }
  0x59   : > { %v203_v62 = vadd.f32 %v202_v58, %v171_v53  ;;  %v274_v0 = vadd.f32 %v273_v60, %v243_v55  ;;  %v187_v53 = vld [vmem:[%s684_s23 + $0xf8] sm:$0xff]  ;;  %v259_v55 = vmul.f32 %v186_v49, %v186_v49 }
  0x5a   : > { %v260_v58 = vmul.f32 %v187_v53, %v187_v53 }
  0x5b   : > { %v204_v2 = vadd.f32 %v203_v62, %v172_v57  ;;  %v275_v4 = vadd.f32 %v274_v0, %v244_v59 }
  0x5d   : > { %v205_v6 = vadd.f32 %v204_v2, %v173_v61  ;;  %v276_v8 = vadd.f32 %v275_v4, %v245_v63 }
  0x5f   : > { %v206_v10 = vadd.f32 %v205_v6, %v174_v1  ;;  %v277_v12 = vadd.f32 %v276_v8, %v246_v3 }
  0x61   : > { %v207_v14 = vadd.f32 %v206_v10, %v175_v5  ;;  %v278_v16 = vadd.f32 %v277_v12, %v247_v7  ;;  %v188_v7 = vld [vmem:[#allocation5] sm:$0x1]  ;;  %v228_v12 = vld [vmem:[#allocation6] sm:$0x1] }
  0x63   : > { %v208_v18 = vadd.f32 %v207_v14, %v176_v9  ;;  %v279_v20 = vadd.f32 %v278_v16, %v248_v11 }
  0x65   : > { %v209_v22 = vadd.f32 %v208_v18, %v177_v13  ;;  %v280_v24 = vadd.f32 %v279_v20, %v249_v15 }
  0x67   : > { %v210_v26 = vadd.f32 %v209_v22, %v178_v17  ;;  %v281_v28 = vadd.f32 %v280_v24, %v250_v19 }
  0x69   : > { %v211_v30 = vadd.f32 %v210_v26, %v179_v21  ;;  %v282_v32 = vadd.f32 %v281_v28, %v251_v23 }
  0x6b   : > { %v212_v34 = vadd.f32 %v211_v30, %v180_v25  ;;  %v283_v36 = vadd.f32 %v282_v32, %v252_v27 }
  0x6d   : > { %v213_v38 = vadd.f32 %v212_v34, %v181_v29  ;;  %v284_v40 = vadd.f32 %v283_v36, %v253_v31 }
  0x6f   : > { %v214_v42 = vadd.f32 %v213_v38, %v182_v33  ;;  %v285_v44 = vadd.f32 %v284_v40, %v254_v35 }
  0x71   : > { %v215_v46 = vadd.f32 %v214_v42, %v183_v37  ;;  %v286_v48 = vadd.f32 %v285_v44, %v255_v39 }
  0x73   : > { %v216_v50 = vadd.f32 %v215_v46, %v184_v41  ;;  %v287_v52 = vadd.f32 %v286_v48, %v256_v43 }
  0x75   : > { %v217_v54 = vadd.f32 %v216_v50, %v185_v45  ;;  %v288_v56 = vadd.f32 %v287_v52, %v257_v47 }
  0x77   : > { %v218_v57 = vadd.f32 %v217_v54, %v186_v49  ;;  %v289_v59 = vadd.f32 %v288_v56, %v258_v51 }
  0x79   : > { %v219_v60 = vadd.f32 %v218_v57, %v187_v53  ;;  %v290_v61 = vadd.f32 %v289_v59, %v259_v55 }
  0x7b   : > { %v220_v62 = vrot.slane %v219_v60, 4  ;;  %v291_v63 = vadd.f32 %v290_v61, %v260_v58 }
  0x7d   : > { %v221_v0 = vadd.f32 %v220_v62, %v219_v60  ;;  %v292_v1 = vrot.slane %v291_v63, 4 }
  0x7f   : > { %v222_v2 = vrot.slane %v221_v0, 2  ;;  %v293_v3 = vadd.f32 %v292_v1, %v291_v63 }
  0x81   : > { %v223_v4 = vadd.f32 %v222_v2, %v221_v0  ;;  %v294_v5 = vrot.slane %v293_v3, 2 }
  0x83   : > { %v224_v6 = vrot.slane %v223_v4, 1  ;;  %v295_v8 = vadd.f32 %v294_v5, %v293_v3 }
  0x85   : > { %v225_v9 = vadd.f32 %v224_v6, %v223_v4  ;;  %v296_v10 = vrot.slane %v295_v8, 1 }
  0x87   : > { %v226_v11 = vadd.f32 %v225_v9, %v188_v7  ;;  %v297_v13 = vadd.f32 %v296_v10, %v295_v8 }
  0x89   : > { %227 = vst [vmem:[#allocation5] sm:$0x1] %v226_v11  ;;  %v298_v14 = vadd.f32 %v297_v13, %v228_v12 }
  0x8a   : > { %494 = shalt.err (!%p491_p0)
}
  0x8b   : > { %s495_s30 = scalar_lea.hbm %s790_s1, 16 }
  0x8c   : > { %p496_p1 = scmp.ne.s32.totalorder %s790_s1, %s495_s30  ;;  %p501_p13 = scmp.lt.u32.totalorder %s495_s30, %s790_s1 }
  0x8e   : > { %p497_p2 = pnand %p496_p1, %p410_p7 }
  0x90   : > { %p498_p11 = pneg %p497_p2 }
  0x92   : > { %p503_p3 = pnand %p501_p13, %p498_p11 }
  0x94   : > { %506 = shalt.err (!%p503_p3)
}
  0x95   : > { %398 = dma.vmem_to_hbm [thread:$0]  (%p410_p7), %s308_s18, 16, %s790_s1, [#allocation4]   ;;  %299 = vst [vmem:[#allocation6] sm:$0x1] %v298_v14 }
  0x96   : > { %s507_s9 = scalar_lea.vmem %s724_s25, 16  ;;  %s513_s15 = scalar_lea.vmem %s724_s25, 32 }
  0x97   : > { %p508_p9 = scmp.ne.s32.totalorder %s724_s25, %s507_s9  ;;  %p514_p5 = scmp.lt.s32.totalorder %s724_s25, %s724_s25 }
  0x98   : > { %p515_p6 = scmp.lt.s32.totalorder %s513_s15, %s507_s9 }
  0x99   : > { %p509_p8 = pnand %p508_p9, %p410_p7 }
  0x9a   : > { %p516_p10 = por %p515_p6, %p514_p5 }
  0x9b   : > { %p510_p4 = pneg %p509_p8 }
  0x9d   : > { %p517_p12 = pnand %p516_p10, %p510_p4 }
  0x9f   : > { %520 = shalt.err (!%p517_p12)
}
  0xa0   : > { %s521_s20 = scalar_lea.hbm %s791_s2, 16 }
  0xa1   : > { %p522_p0 = scmp.ne.s32.totalorder %s791_s2, %s521_s20  ;;  %p527_p11 = scmp.lt.u32.totalorder %s521_s20, %s791_s2 }
  0xa3   : > { %p523_p1 = pnand %p522_p0, %p410_p7 }
  0xa5   : > { %p524_p2 = pneg %p523_p1 }
  0xa7   : > { %p529_p13 = pnand %p527_p11, %p524_p2 }
  0xa9   : > { %532 = shalt.err (!%p529_p13)
}
  0xaa   : > { %400 = dma.vmem_to_hbm [thread:$0]  (%p410_p7), %s724_s25, 16, %s791_s2, [#allocation7]  }
  0xab   : > { %554 = dma.done.wait (%p410_p7), [#allocation4], 16  }
  0xac   : > { %556 = vsyncadd (%p410_p7), [#allocation4], 4294967280 }
  0xad   : > { %558 = dma.done.wait (%p410_p7), [#allocation7], 16  }
  0xae   : > { %560 = vsyncadd (%p410_p7), [#allocation7], 4294967280 }
  0xaf PF: > { %p15_p3 = scmp.ge.s32.totalorder %s620_s14, 4   ;;  %s795_s9 = smov %s567_s10 }
  0xb0   : > { %s796_s10 = smov %s571_s11  ;;  %s797_s11 = smov %s630_s17 }
  0xb1   : > { %s798_s12 = smov %s620_s14  ;;  %17 = sbr.rel (!%p15_p3) target bundleno = 5 (0x5), region = 73 }
  0xb8   :  { %335 = vsyncpa [#allocation3], 1 }
  0xb9   :  { %337 = vsyncpa [#allocation3 + $0x1], 1 }
  0xba   :  { %338 = vsyncpa [#allocation4], 1 }
  0xbb   :  { %340 = vsyncpa [#allocation4 + $0x1], 1 }
  0xbc   :  { %341 = vsyncpa [#allocation7], 1 }

</bundles_post_ra>
